<compile_context>
chip_gen: v5e
topology: v5e:2x2
jax: 0.10.0
libtpu: 0.0.40
codegen_flags: <defaults>
</compile_context>

<pallas_src>
import functools
import math

import numpy as np
import jax
import jax.numpy as jnp
from jax import lax
from jax.experimental import pallas as pl
from jax.experimental.pallas import tpu as pltpu


# -----------------------------------------------------------------------------
# Pallas kernel: fused gate-convs (3x3, out_ch=1, x2 branches) + gating + combine
# -----------------------------------------------------------------------------
def _fs_kernel(width, x_ref, low_ref, top_ref, bot_ref, w_ref, b_ref, o_ref):
    # x_ref/low_ref : (1, C, TH*W) native dtype   (x is also the att_feat)
    # top_ref/bot_ref:(1, 1, C, W) native dtype   row above / below this tile (zeros at border)
    # w_ref         : (18, C) f32  row 2*t = high(sigmoid) branch tap t, 2*t+1 = low branch
    # b_ref         : (2,)    f32  SMEM  (b_high, b_low)
    # o_ref         : (1, C, TH*W)
    f32 = jnp.float32
    t_hw = x_ref.shape[2]
    L = t_hw + 2 * width                       # halo-padded flat tile length
    L128 = ((L + 127) // 128) * 128            # lane-dense padded length

    att = x_ref[0].astype(f32)                 # (C, TH*W)
    top = top_ref[0, 0].astype(f32)            # (C, W)
    bot = bot_ref[0, 0].astype(f32)            # (C, W)
    wts = w_ref[...]                           # (18, C)

    # ---- channel contraction on the MXU, full precision (hidden under DMA) ----
    hp = lax.Precision.HIGHEST
    taps_c = jnp.dot(wts, att, preferred_element_type=f32, precision=hp)   # (18, TH*W)
    taps_t = jnp.dot(wts, top, preferred_element_type=f32, precision=hp)   # (18, W)
    taps_b = jnp.dot(wts, bot, preferred_element_type=f32, precision=hp)   # (18, W)
    pieces = [taps_t, taps_c, taps_b]
    if L128 > L:
        pieces.append(jnp.zeros((18, L128 - L), f32))
    taps = jnp.concatenate(pieces, axis=1)     # (18, L128): [top row | tile | bottom row | 0s]

    # ---- in-kernel column-validity masks (dest position); no HBM mask array ----
    # col = pos mod width, computed with float ops only (robust, VPU-friendly).
    pos = lax.broadcasted_iota(jnp.int32, (1, L128), 1).astype(f32)
    row = jnp.floor((pos + 0.5) * (1.0 / width))
    col = pos - row * width
    mask_l = (col >= 0.5).astype(f32)                  # tap dx = -1 valid (col >= 1)
    mask_r = (col <= width - 1.5).astype(f32)          # tap dx = +1 valid (col <= W-2)

    # ---- 3x3 tap-shift accumulation over the halo-padded flat tile (XLU rolls) ----
    acc = jnp.zeros((2, L128), f32)
    for t in range(9):
        dy, dx = t // 3 - 1, t % 3 - 1
        off = dy * width + dx
        pair = taps[2 * t:2 * t + 2, :]                # (2, L128): (high_tap, low_tap)
        if off != 0:
            # pair'[p] = taps[(p + off) mod L128]; wrap corners are masked below.
            pair = pltpu.roll(pair, shift=(-off) % L128, axis=1)
        if dx == -1:
            pair = pair * mask_l
        elif dx == 1:
            pair = pair * mask_r
        acc = acc + pair
    acc = acc[:, width:width + t_hw]                   # drop halo rows -> (2, TH*W)

    # high-frequency branch: sigmoid(.)*2 (sp_act); lowfreq_att branch: NO activation.
    fw_high = jax.nn.sigmoid(acc[0:1, :] + b_ref[0]) * 2.0
    fw_low = acc[1:2, :] + b_ref[1]

    lowv = low_ref[0].astype(f32)
    out = fw_high * (att - lowv) + fw_low * lowv
    o_ref[0] = out.astype(o_ref.dtype)                 # single lane-dense store


# -----------------------------------------------------------------------------
# Wrapper: FFT low-pass split (plain JAX) + tiled pallas_call
# -----------------------------------------------------------------------------
def _vmem_capacity_bytes():
    try:
        info = pltpu.get_tpu_info()
        for attr in ("vmem_capacity_bytes", "vmem_bytes", "vmem_size_bytes"):
            v = getattr(info, attr, None)
            if isinstance(v, (int, np.integer)) and v > 0:
                return int(v)
    except Exception:
        pass
    return 64 << 20                                    # v7x-safe fallback


def _choose_row_tile(H, W, C, in_bytes, budget):
    """Largest row-tile TH that divides H, keeps TH*W a multiple of 128 lanes, and
    whose double-buffered blocks + f32 temps fit the VMEM budget."""
    unit = 128 // math.gcd(W, 128)                     # smallest lane-dense row count
    per_row = C * W * (6 * in_bytes + 16) + 128 * W    # blocks (x/low/out, x2) + temps + taps
    lane_dense = [d for d in range(unit, H, unit) if H % d == 0]
    if lane_dense:
        fits = [d for d in lane_dense if d * per_row <= budget]
        return max(fits) if fits else min(lane_dense)
    # TODO(synk): when H*W has no lane-dense proper row tile (e.g. 14x14 maps), pad HW
    # up to a multiple of 128 (and rebuild flat offsets) instead of the whole-image
    # fallback with partially-masked stores.
    return H


def frequency_selection_pallas(x, w0, b0, w1, b1, k=2):
    """x: (B, C, H, W). w0/w1: (1, C, 3, 3). b0/b1: (1,)."""
    B, C, H, W = x.shape
    HW = H * W
    in_bytes = jnp.dtype(x.dtype).itemsize

    # ---- FFT low-pass split (plain JAX glue; FFT has no Pallas equivalent) ----
    # Matches PyTorch quirk: `.type(x.dtype)` on a complex tensor discards imag part.
    xf32 = x.astype(jnp.float32)
    spec = jnp.fft.fftshift(jnp.fft.fft2(xf32, norm='ortho'), axes=(-2, -1))
    x_fft = jnp.real(spec).astype(x.dtype)
    lo_h = int(round(H / 2 - H / (2 * k))); hi_h = int(round(H / 2 + H / (2 * k)))
    lo_w = int(round(W / 2 - W / (2 * k))); hi_w = int(round(W / 2 + W / (2 * k)))
    spec_mask = jnp.zeros((1, 1, H, W), jnp.float32).at[:, :, lo_h:hi_h, lo_w:hi_w].set(1.0)
    low = jnp.real(jnp.fft.ifft2(
        jnp.fft.ifftshift(x_fft.astype(jnp.float32) * spec_mask, axes=(-2, -1)),
        norm='ortho')).astype(x.dtype)                 # PyTorch keeps low in x.dtype

    # ---- row-tile selection (v7x: 64 MiB VMEM/TC; shrink tile, not raise limit) ----
    vmem_cap = _vmem_capacity_bytes()
    budget = max(int(vmem_cap * 0.6) - (4 << 20), 1 << 20)
    TH = _choose_row_tile(H, W, C, in_bytes, budget)
    n_t = H // TH
    t_hw = TH * W

    # ---- native-dtype, lane-dense flat layout (no f32 up-cast of the big tensors) ----
    x_flat = x.reshape(B, C, HW)
    low_flat = low.reshape(B, C, HW)

    # ---- 1-row halos per tile; zero rows at image borders == conv zero padding ----
    zrow = jnp.zeros((B, 1, C, W), x.dtype)
    if n_t > 1:
        top_n = jnp.transpose(x[:, :, TH - 1:H - 1:TH, :], (0, 2, 1, 3))   # (B, n_t-1, C, W)
        bot_n = jnp.transpose(x[:, :, TH:H:TH, :], (0, 2, 1, 3))           # (B, n_t-1, C, W)
        halo_top = jnp.concatenate([zrow, top_n], axis=1)                  # (B, n_t, C, W)
        halo_bot = jnp.concatenate([bot_n, zrow], axis=1)
    else:
        halo_top, halo_bot = zrow, zrow

    # ---- pack conv weights: row 2*t = high-branch tap t, row 2*t+1 = low-branch ----
    w0_t = jnp.transpose(w0.reshape(C, 9).astype(jnp.float32))             # (9, C)
    w1_t = jnp.transpose(w1.reshape(C, 9).astype(jnp.float32))
    wpack = jnp.stack([w0_t, w1_t], axis=1).reshape(18, C)                 # (18, C)
    bpack = jnp.stack([b0.reshape(()), b1.reshape(())]).astype(jnp.float32)  # (2,)

    # ---- generation-aware VMEM request with compiler headroom ----
    blk = C * t_hw
    need = 2 * (3 * blk + 2 * C * W) * in_bytes        # dbl-buffered x/low/out + halos
    need += 12 * blk                                   # in-kernel f32 temporaries
    need += 96 * (t_hw + 2 * W + 256) + 2 * 18 * C * 4  # taps/acc/masks + weights
    need += 4 << 20
    vmem_limit = int(min(max(need, 16 << 20), int(vmem_cap * 0.85)))

    cost = pl.CostEstimate(
        flops=int(B * (2 * 18 * C * (HW + 2 * n_t * W) + 26 * HW + 6 * C * HW)),
        transcendentals=int(B * HW),
        bytes_accessed=int(B * (3 * C * HW + 4 * n_t * C * W) * in_bytes
                           + B * n_t * (18 * C + 2) * 4),
    )

    out_flat = pl.pallas_call(
        functools.partial(_fs_kernel, W),
        out_shape=jax.ShapeDtypeStruct((B, C, HW), x.dtype),
        grid=(B, n_t),
        in_specs=[
            pl.BlockSpec((1, C, t_hw), lambda b, t: (b, 0, t)),      # x (= att_feat)
            pl.BlockSpec((1, C, t_hw), lambda b, t: (b, 0, t)),      # low
            pl.BlockSpec((1, 1, C, W), lambda b, t: (b, t, 0, 0)),   # halo row above
            pl.BlockSpec((1, 1, C, W), lambda b, t: (b, t, 0, 0)),   # halo row below
            pl.BlockSpec((18, C), lambda b, t: (0, 0)),              # packed conv weights
            pl.BlockSpec(memory_space=pltpu.MemorySpace.SMEM),       # biases (2,)
        ],
        out_specs=pl.BlockSpec((1, C, t_hw), lambda b, t: (b, 0, t)),
        compiler_params=pltpu.CompilerParams(
            dimension_semantics=("parallel", "parallel"),
            vmem_limit_bytes=vmem_limit,
        ),
        cost_estimate=cost,
    )(x_flat, low_flat, halo_top, halo_bot, wpack, bpack)
    return out_flat.reshape(B, C, H, W)


# -----------------------------------------------------------------------------
# Pure-JAX reference (mirrors the PyTorch forward) for verification
# -----------------------------------------------------------------------------
def frequency_selection_ref(x, w0, b0, w1, b1, k=2):
    B, C, H, W = x.shape
    xf = x.astype(jnp.float32)
    spec = jnp.fft.fftshift(jnp.fft.fft2(xf, norm='ortho'), axes=(-2, -1))
    x_fft = jnp.real(spec).astype(x.dtype)
    lo_h = int(round(H / 2 - H / (2 * k))); hi_h = int(round(H / 2 + H / (2 * k)))
    lo_w = int(round(W / 2 - W / (2 * k))); hi_w = int(round(W / 2 + W / (2 * k)))
    mask = jnp.zeros((1, 1, H, W), jnp.float32).at[:, :, lo_h:hi_h, lo_w:hi_w].set(1.0)
    low = jnp.real(jnp.fft.ifft2(jnp.fft.ifftshift(x_fft.astype(jnp.float32) * mask,
                                                   axes=(-2, -1)),
                                 norm='ortho')).astype(x.dtype).astype(jnp.float32)
    high = xf - low

    def conv(att, w, b):
        y = lax.conv_general_dilated(att, w.astype(jnp.float32), (1, 1), 'SAME',
                                     dimension_numbers=('NCHW', 'OIHW', 'NCHW'),
                                     precision=lax.Precision.HIGHEST)
        return y + b.reshape(1, -1, 1, 1).astype(jnp.float32)

    fw_high = jax.nn.sigmoid(conv(xf, w0, b0)) * 2.0   # sp_act
    fw_low = conv(xf, w1, b1)                          # no activation (lowfreq_att)
    out = fw_high * high + fw_low * low
    return out.astype(x.dtype)


if __name__ == "__main__":
    def run_case(B, C, H, W, dtype, rtol, atol):
        key = jax.random.PRNGKey(0)
        kx, kw0, kb0, kw1, kb1 = jax.random.split(key, 5)
        x = jax.random.normal(kx, (B, C, H, W), jnp.float32).astype(dtype)
        # Non-zero params for the two freq_weight convs
        # (Conv2d(in=C, out=spatial_group=1, k=3, groups=1, padding=1, bias=True)).
        w0 = 0.1 * jax.random.normal(kw0, (1, C, 3, 3), jnp.float32)
        b0 = 0.1 * jax.random.normal(kb0, (1,), jnp.float32)
        w1 = 0.1 * jax.random.normal(kw1, (1, C, 3, 3), jnp.float32)
        b1 = 0.1 * jax.random.normal(kb1, (1,), jnp.float32)

        out = jax.block_until_ready(frequency_selection_pallas(x, w0, b0, w1, b1, k=2))
        ref = jax.block_until_ready(frequency_selection_ref(x, w0, b0, w1, b1, k=2))
        np.testing.assert_allclose(np.asarray(out, dtype=np.float32),
                                   np.asarray(ref, dtype=np.float32),
                                   rtol=rtol, atol=atol)

    # f32, small C; row-tiled path (TH=8 -> 2 tiles/image, halo exchange exercised).
    run_case(2, 4, 16, 16, jnp.float32, rtol=1e-3, atol=1e-3)
    # f32, larger C (MXU contraction at HIGHEST precision), still tiled.
    run_case(2, 64, 16, 16, jnp.float32, rtol=1e-3, atol=1e-3)
    # bf16 inputs stay bf16 on the wire (half the HBM traffic); f32 compute in-kernel.
    run_case(2, 32, 16, 16, jnp.bfloat16, rtol=2e-2, atol=1e-2)
    # Odd spatial size: no lane-dense row tile exists -> whole-image fallback path.
    run_case(1, 8, 12, 12, jnp.float32, rtol=1e-3, atol=1e-3)

    print("KERNEL_OK")
</pallas_src>

<mosaic_0001>
module attributes {stable_mosaic.version = 11 : i64} {
  func.func @_fs_kernel(%arg0: i32, %arg1: i32, %arg2: memref<1x4x128xf32, #tpu.memory_space<vmem>>, %arg3: memref<1x4x128xf32, #tpu.memory_space<vmem>>, %arg4: memref<1x1x4x16xf32, #tpu.memory_space<vmem>>, %arg5: memref<1x1x4x16xf32, #tpu.memory_space<vmem>>, %arg6: memref<18x4xf32, #tpu.memory_space<vmem>>, %arg7: memref<2xf32, #tpu.memory_space<smem>>, %arg8: memref<1x4x128xf32, #tpu.memory_space<vmem>>) attributes {dimension_semantics = [#tpu.dimension_semantics<parallel>, #tpu.dimension_semantics<parallel>], iteration_bounds = array<i64: 2, 2>, scalar_prefetch = 0 : i64, scratch_operands = 0 : i64, tpu.core_type = #tpu.core_type<tc>, window_params = [{transform_indices = @transform_0, window_bounds = array<i64: 1, 4, 128>}, {transform_indices = @transform_1, window_bounds = array<i64: 1, 4, 128>}, {transform_indices = @transform_2, window_bounds = array<i64: 1, 1, 4, 16>}, {transform_indices = @transform_3, window_bounds = array<i64: 1, 1, 4, 16>}, {pipeline_mode = #tpu.pipeline_mode<synchronous>, transform_indices = @transform_4, window_bounds = array<i64: 18, 4>}, {transform_indices = @transform_5, window_bounds = array<i64: 2>}, {transform_indices = @transform_6, window_bounds = array<i64: 1, 4, 128>}]} {
    %c0 = arith.constant 0 : index
    %c0_0 = arith.constant 0 : index
    %c0_1 = arith.constant 0 : index
    %0 = vector.load %arg2[%c0, %c0_0, %c0_1] : memref<1x4x128xf32, #tpu.memory_space<vmem>>, vector<1x4x128xf32>
    %1 = vector.shape_cast %0 : vector<1x4x128xf32> to vector<4x128xf32>
    %c0_2 = arith.constant 0 : index
    %c0_3 = arith.constant 0 : index
    %c0_4 = arith.constant 0 : index
    %c0_5 = arith.constant 0 : index
    %2 = vector.load %arg4[%c0_2, %c0_3, %c0_4, %c0_5] : memref<1x1x4x16xf32, #tpu.memory_space<vmem>>, vector<1x1x4x16xf32>
    %3 = vector.shape_cast %2 : vector<1x1x4x16xf32> to vector<4x16xf32>
    %c0_6 = arith.constant 0 : index
    %c0_7 = arith.constant 0 : index
    %c0_8 = arith.constant 0 : index
    %c0_9 = arith.constant 0 : index
    %4 = vector.load %arg5[%c0_6, %c0_7, %c0_8, %c0_9] : memref<1x1x4x16xf32, #tpu.memory_space<vmem>>, vector<1x1x4x16xf32>
    %5 = vector.shape_cast %4 : vector<1x1x4x16xf32> to vector<4x16xf32>
    %c0_10 = arith.constant 0 : index
    %c0_11 = arith.constant 0 : index
    %6 = vector.load %arg6[%c0_10, %c0_11] : memref<18x4xf32, #tpu.memory_space<vmem>>, vector<18x4xf32>
    %cst = arith.constant dense<0.000000e+00> : vector<18x128xf32>
    %7 = tpu.matmul %6, %1, %cst {dimension_numbers = #tpu.dot_dimension_numbers<[1], [0], [0], [1], [0, 0, 1, 1], [], []>, precision = #tpu.contract_precision<fp32>} : vector<18x4xf32>, vector<4x128xf32>, vector<18x128xf32> -> vector<18x128xf32>
    %cst_12 = arith.constant dense<0.000000e+00> : vector<18x16xf32>
    %8 = tpu.matmul %6, %3, %cst_12 {dimension_numbers = #tpu.dot_dimension_numbers<[1], [0], [0], [1], [0, 0, 1, 1], [], []>, precision = #tpu.contract_precision<fp32>} : vector<18x4xf32>, vector<4x16xf32>, vector<18x16xf32> -> vector<18x16xf32>
    %cst_13 = arith.constant dense<0.000000e+00> : vector<18x16xf32>
    %9 = tpu.matmul %6, %5, %cst_13 {dimension_numbers = #tpu.dot_dimension_numbers<[1], [0], [0], [1], [0, 0, 1, 1], [], []>, precision = #tpu.contract_precision<fp32>} : vector<18x4xf32>, vector<4x16xf32>, vector<18x16xf32> -> vector<18x16xf32>
    %cst_14 = arith.constant 0.000000e+00 : f32
    %10 = vector.broadcast %cst_14 : f32 to vector<18x96xf32>
    %11 = tpu.concatenate %8, %7, %9, %10 in 1 : vector<18x16xf32>, vector<18x128xf32>, vector<18x16xf32>, vector<18x96xf32> -> vector<18x256xf32>
    %12 = tpu.iota {dimensions = array<i32: 1>} : vector<1x256xi32>
    %13 = arith.sitofp %12 : vector<1x256xi32> to vector<1x256xf32>
    %cst_15 = arith.constant 5.000000e-01 : f32
    %14 = vector.broadcast %cst_15 : f32 to vector<1x256xf32>
    %15 = arith.addf %13, %14 : vector<1x256xf32>
    %cst_16 = arith.constant 6.250000e-02 : f32
    %16 = vector.broadcast %cst_16 : f32 to vector<1x256xf32>
    %17 = arith.mulf %15, %16 : vector<1x256xf32>
    %18 = math.floor %17 : vector<1x256xf32>
    %cst_17 = arith.constant 1.600000e+01 : f32
    %19 = vector.broadcast %cst_17 : f32 to vector<1x256xf32>
    %20 = arith.mulf %18, %19 : vector<1x256xf32>
    %21 = arith.subf %13, %20 : vector<1x256xf32>
    %cst_18 = arith.constant 5.000000e-01 : f32
    %22 = vector.broadcast %cst_18 : f32 to vector<1x256xf32>
    %23 = arith.cmpf oge, %21, %22 : vector<1x256xf32>
    %24 = arith.extui %23 : vector<1x256xi1> to vector<1x256xi32>
    %25 = arith.sitofp %24 : vector<1x256xi32> to vector<1x256xf32>
    %cst_19 = arith.constant 1.450000e+01 : f32
    %26 = vector.broadcast %cst_19 : f32 to vector<1x256xf32>
    %27 = arith.cmpf ole, %21, %26 : vector<1x256xf32>
    %28 = arith.extui %27 : vector<1x256xi1> to vector<1x256xi32>
    %29 = arith.sitofp %28 : vector<1x256xi32> to vector<1x256xf32>
    %cst_20 = arith.constant 0.000000e+00 : f32
    %30 = vector.broadcast %cst_20 : f32 to vector<2x256xf32>
    %31 = vector.extract_strided_slice %11 {offsets = [0, 0], sizes = [2, 256], strides = [1, 1]} : vector<18x256xf32> to vector<2x256xf32>
    %c17_i32 = arith.constant 17 : i32
    %32 = tpu.dynamic_rotate %31 by %c17_i32 dim 1 : vector<2x256xf32>, i32 -> vector<2x256xf32>
    %33 = vector.broadcast %25 : vector<1x256xf32> to vector<2x256xf32>
    %34 = arith.mulf %32, %33 : vector<2x256xf32>
    %35 = arith.addf %30, %34 : vector<2x256xf32>
    %36 = vector.extract_strided_slice %11 {offsets = [2, 0], sizes = [2, 256], strides = [1, 1]} : vector<18x256xf32> to vector<2x256xf32>
    %c16_i32 = arith.constant 16 : i32
    %37 = tpu.dynamic_rotate %36 by %c16_i32 dim 1 : vector<2x256xf32>, i32 -> vector<2x256xf32>
    %38 = arith.addf %35, %37 : vector<2x256xf32>
    %39 = vector.extract_strided_slice %11 {offsets = [4, 0], sizes = [2, 256], strides = [1, 1]} : vector<18x256xf32> to vector<2x256xf32>
    %c15_i32 = arith.constant 15 : i32
    %40 = tpu.dynamic_rotate %39 by %c15_i32 dim 1 : vector<2x256xf32>, i32 -> vector<2x256xf32>
    %41 = vector.broadcast %29 : vector<1x256xf32> to vector<2x256xf32>
    %42 = arith.mulf %40, %41 : vector<2x256xf32>
    %43 = arith.addf %38, %42 : vector<2x256xf32>
    %44 = vector.extract_strided_slice %11 {offsets = [6, 0], sizes = [2, 256], strides = [1, 1]} : vector<18x256xf32> to vector<2x256xf32>
    %c1_i32 = arith.constant 1 : i32
    %45 = tpu.dynamic_rotate %44 by %c1_i32 dim 1 : vector<2x256xf32>, i32 -> vector<2x256xf32>
    %46 = vector.broadcast %25 : vector<1x256xf32> to vector<2x256xf32>
    %47 = arith.mulf %45, %46 : vector<2x256xf32>
    %48 = arith.addf %43, %47 : vector<2x256xf32>
    %49 = vector.extract_strided_slice %11 {offsets = [8, 0], sizes = [2, 256], strides = [1, 1]} : vector<18x256xf32> to vector<2x256xf32>
    %50 = arith.addf %48, %49 : vector<2x256xf32>
    %51 = vector.extract_strided_slice %11 {offsets = [10, 0], sizes = [2, 256], strides = [1, 1]} : vector<18x256xf32> to vector<2x256xf32>
    %c255_i32 = arith.constant 255 : i32
    %52 = tpu.dynamic_rotate %51 by %c255_i32 dim 1 : vector<2x256xf32>, i32 -> vector<2x256xf32>
    %53 = vector.broadcast %29 : vector<1x256xf32> to vector<2x256xf32>
    %54 = arith.mulf %52, %53 : vector<2x256xf32>
    %55 = arith.addf %50, %54 : vector<2x256xf32>
    %56 = vector.extract_strided_slice %11 {offsets = [12, 0], sizes = [2, 256], strides = [1, 1]} : vector<18x256xf32> to vector<2x256xf32>
    %c241_i32 = arith.constant 241 : i32
    %57 = tpu.dynamic_rotate %56 by %c241_i32 dim 1 : vector<2x256xf32>, i32 -> vector<2x256xf32>
    %58 = vector.broadcast %25 : vector<1x256xf32> to vector<2x256xf32>
    %59 = arith.mulf %57, %58 : vector<2x256xf32>
    %60 = arith.addf %55, %59 : vector<2x256xf32>
    %61 = vector.extract_strided_slice %11 {offsets = [14, 0], sizes = [2, 256], strides = [1, 1]} : vector<18x256xf32> to vector<2x256xf32>
    %c240_i32 = arith.constant 240 : i32
    %62 = tpu.dynamic_rotate %61 by %c240_i32 dim 1 : vector<2x256xf32>, i32 -> vector<2x256xf32>
    %63 = arith.addf %60, %62 : vector<2x256xf32>
    %64 = vector.extract_strided_slice %11 {offsets = [16, 0], sizes = [2, 256], strides = [1, 1]} : vector<18x256xf32> to vector<2x256xf32>
    %c239_i32 = arith.constant 239 : i32
    %65 = tpu.dynamic_rotate %64 by %c239_i32 dim 1 : vector<2x256xf32>, i32 -> vector<2x256xf32>
    %66 = vector.broadcast %29 : vector<1x256xf32> to vector<2x256xf32>
    %67 = arith.mulf %65, %66 : vector<2x256xf32>
    %68 = arith.addf %63, %67 : vector<2x256xf32>
    %69 = vector.extract_strided_slice %68 {offsets = [0, 16], sizes = [2, 128], strides = [1, 1]} : vector<2x256xf32> to vector<2x128xf32>
    %70 = vector.extract_strided_slice %69 {offsets = [0, 0], sizes = [1, 128], strides = [1, 1]} : vector<2x128xf32> to vector<1x128xf32>
    %c0_21 = arith.constant 0 : index
    %71 = memref.load %arg7[%c0_21] : memref<2xf32, #tpu.memory_space<smem>>
    %72 = vector.broadcast %71 : f32 to vector<1x128xf32>
    %73 = arith.addf %70, %72 : vector<1x128xf32>
    %74 = arith.negf %73 : vector<1x128xf32>
    %75 = math.exp %74 : vector<1x128xf32>
    %cst_22 = arith.constant 1.000000e+00 : f32
    %76 = vector.broadcast %cst_22 : f32 to vector<1x128xf32>
    %77 = arith.addf %76, %75 : vector<1x128xf32>
    %78 = arith.divf %76, %77 : vector<1x128xf32>
    %cst_23 = arith.constant 2.000000e+00 : f32
    %79 = vector.broadcast %cst_23 : f32 to vector<1x128xf32>
    %80 = arith.mulf %78, %79 : vector<1x128xf32>
    %81 = vector.extract_strided_slice %69 {offsets = [1, 0], sizes = [1, 128], strides = [1, 1]} : vector<2x128xf32> to vector<1x128xf32>
    %c1 = arith.constant 1 : index
    %82 = memref.load %arg7[%c1] : memref<2xf32, #tpu.memory_space<smem>>
    %83 = vector.broadcast %82 : f32 to vector<1x128xf32>
    %84 = arith.addf %81, %83 : vector<1x128xf32>
    %c0_24 = arith.constant 0 : index
    %c0_25 = arith.constant 0 : index
    %c0_26 = arith.constant 0 : index
    %85 = vector.load %arg3[%c0_24, %c0_25, %c0_26] : memref<1x4x128xf32, #tpu.memory_space<vmem>>, vector<1x4x128xf32>
    %86 = vector.shape_cast %85 : vector<1x4x128xf32> to vector<4x128xf32>
    %87 = arith.subf %1, %86 : vector<4x128xf32>
    %88 = vector.broadcast %80 : vector<1x128xf32> to vector<4x128xf32>
    %89 = arith.mulf %88, %87 : vector<4x128xf32>
    %90 = vector.broadcast %84 : vector<1x128xf32> to vector<4x128xf32>
    %91 = arith.mulf %90, %86 : vector<4x128xf32>
    %92 = arith.addf %89, %91 : vector<4x128xf32>
    %c0_27 = arith.constant 0 : index
    %c0_28 = arith.constant 0 : index
    %c0_29 = arith.constant 0 : index
    %93 = vector.load %arg8[%c0_27, %c0_28, %c0_29] : memref<1x4x128xf32, #tpu.memory_space<vmem>>, vector<1x4x128xf32>
    %94 = vector.shape_cast %93 : vector<1x4x128xf32> to vector<4x128xf32>
    %95 = vector.shape_cast %92 : vector<4x128xf32> to vector<1x4x128xf32>
    tpu.vector_store %arg8[%c0_27, %c0_28, %c0_29], %95 {strides = array<i32>} : memref<1x4x128xf32, #tpu.memory_space<vmem>>, vector<1x4x128xf32>,
    return
  }
  func.func @transform_0(%arg0: i32, %arg1: i32) -> (i32, i32, i32) {
    %c0_i32 = arith.constant 0 : i32
    %c0_i32_0 = arith.constant 0 : i32
    return %arg0, %c0_i32, %arg1 : i32, i32, i32
  }
  func.func @transform_1(%arg0: i32, %arg1: i32) -> (i32, i32, i32) {
    %c0_i32 = arith.constant 0 : i32
    %c0_i32_0 = arith.constant 0 : i32
    return %arg0, %c0_i32, %arg1 : i32, i32, i32
  }
  func.func @transform_2(%arg0: i32, %arg1: i32) -> (i32, i32, i32, i32) {
    %c0_i32 = arith.constant 0 : i32
    %c0_i32_0 = arith.constant 0 : i32
    %c0_i32_1 = arith.constant 0 : i32
    return %arg0, %arg1, %c0_i32, %c0_i32_0 : i32, i32, i32, i32
  }
  func.func @transform_3(%arg0: i32, %arg1: i32) -> (i32, i32, i32, i32) {
    %c0_i32 = arith.constant 0 : i32
    %c0_i32_0 = arith.constant 0 : i32
    %c0_i32_1 = arith.constant 0 : i32
    return %arg0, %arg1, %c0_i32, %c0_i32_0 : i32, i32, i32, i32
  }
  func.func @transform_4(%arg0: i32, %arg1: i32) -> (i32, i32) {
    %c0_i32 = arith.constant 0 : i32
    %c0_i32_0 = arith.constant 0 : i32
    %c0_i32_1 = arith.constant 0 : i32
    return %c0_i32, %c0_i32_0 : i32, i32
  }
  func.func @transform_5(%arg0: i32, %arg1: i32) -> i32 {
    %c0_i32 = arith.constant 0 : i32
    %c0_i32_0 = arith.constant 0 : i32
    return %c0_i32 : i32
  }
  func.func @transform_6(%arg0: i32, %arg1: i32) -> (i32, i32, i32) {
    %c0_i32 = arith.constant 0 : i32
    %c0_i32_0 = arith.constant 0 : i32
    return %arg0, %c0_i32, %arg1 : i32, i32, i32
  }
}

</mosaic_0001>

<bundles_post_ra>
// kernel: tpu_custom_call.1
= control target key start
LH: loop header
LB: loop body
LE: loop exit
PB: predicated region body
PF: predicated region fallthrough
CT: control target
= control target key end

     0   :  { %s2284_s0 = inlined_call_operand.vmem [shape: f32[2,4,256], index: 0, kind: input, shape index: {}]   ;;  %s2285_s1 = inlined_call_operand.hbm [shape: f32[2,4,256], index: 1, kind: input, shape index: {}]   ;;  %s2286_s2 = inlined_call_operand.hbm [shape: f32[2,2,4,16], index: 2, kind: input, shape index: {}]   ;;  %s2287_s3 = inlined_call_operand.hbm [shape: f32[2,2,4,16], index: 3, kind: input, shape index: {}]   ;;  %s2288_s4 = inlined_call_operand.vmem [shape: f32[18,4], index: 4, kind: input, shape index: {}]   ;;  %s2289_s5 = inlined_call_operand.vmem [shape: f32[2], index: 5, kind: input, shape index: {}]   ;;  %s2290_s6 = inlined_call_operand.hbm [shape: f32[2,4,256], index: 6, kind: output, shape index: {}]  }
   0x1   :  { %2298 = sst [smem:[#allocation22_spill]] %s2285_s1 }
   0x2   :  { %2299 = sst [smem:[#allocation23_spill]] %s2286_s2 }
   0x3   :  { %2300 = sst [smem:[#allocation24_spill]] %s2289_s5 }
   0x4   :  { %11 = vsyncpa [#allocation3], 0 }
   0x5   :  { %13 = vsyncpa [#allocation3 + $0x1], 0 }
   0x6   :  { %14 = vsyncpa [#allocation7], 0 }
   0x7   :  { %16 = vsyncpa [#allocation7 + $0x1], 0 }
   0x8   :  { %17 = vsyncpa [#allocation5], 0 }
   0x9   :  { %18 = vsyncpa [#allocation4], 0 }
   0xa   :  { %20 = vsyncpa [#allocation4 + $0x1], 0  ;;  %s1909_s21 = smov 0   ;;  %s1911_s22 = smov 0  }
   0xb   :  { %s1913_s23 = smov 0   ;;  %s1915_s24 = smov 0  }
   0xc   :  { %s1917_s25 = smov 0   ;;  %s1919_s26 = smov 0  }
   0xd   :  { %s1921_s27 = smov 0   ;;  %s1923_s28 = smov 0  }
   0xe LB: > { %2301 = sst [smem:[#allocation15_spill]] %s1834_s21  ;;  %s35_s29 = sadd.s32 1, %s1854_s26  ;;  %s1862_s28 = sphi %s1923_s28, %s26_s28   ;;  %s1858_s27 = sphi %s1921_s27, %s2327_s27   ;;  %s1854_s26 = sphi %s1919_s26, %s2322_s26   ;;  %s1850_s25 = sphi %s1917_s25, %s2321_s25   ;;  %s1846_s24 = sphi %s1915_s24, %s2320_s24   ;;  %s1842_s23 = sphi %s1913_s23, %s2326_s23   ;;  %s1838_s22 = sphi %s1911_s22, %s2325_s22   ;;  %s1834_s21 = sphi %s1909_s21, %s2324_s21  }
   0xf   : > { %2302 = sst [smem:[#allocation16_spill]] %s1854_s26  ;;  %s38_s30 = sadd.s32 1, %s1858_s27 }
  0x10   : > { %2303 = sst [smem:[#allocation17_spill]] %s1858_s27  ;;  %p36_p0 = scmp.ge.s32.totalorder %s35_s29, 2 }
  0x11   : > { %s75_s7 = sadd.s32 1, %s1842_s23  ;;  %p82_p1 = scmp.ne.s32.totalorder %s1842_s23, %s1838_s22 }
  0x12   : > { %p83_p2 = scmp.eq.s32.totalorder %s1862_s28, 0  ;;  %s2329_s29 = smov (%p36_p0, %s35_s29), 0 }
  0x13   : > { %2304 = sst [smem:[#allocation18_spill]] %s2329_s29  ;;  %s2331_s30 = smov (!%p36_p0, %s38_s30), %s1858_s27 }
  0x14   : > { %s71_s8 = ssub.s32 %s1854_s26, %s2329_s29  ;;  %p84_p3 = por %p83_p2, %p82_p1 }
  0x15   : > { %p40_p4 = scmp.ge.s32.totalorder %s2331_s30, 2  ;;  %p1566_p5 = scmp.lt.s32.totalorder %s1862_s28, 4 }
  0x16   : > { %s2291_s9 = sand.u32 1, %s1842_s23   ;;  %s1505_s11 = sshll.u32 %s1858_s27, 1 }
  0x17   : > { %s2333_s30 = smov (%p40_p4, %s2331_s30), 0  ;;  %s1969_s10 = sshll.u32 %s2291_s9, 2 }
  0x18   : > { %2305 = sst [smem:[#allocation19_spill]] %s2333_s30  ;;  %s70_s12 = ssub.s32 %s1858_s27, %s2333_s30 }
  0x19   : > { %s270_s13 = sadd.s32 %s1854_s26, %s1505_s11  ;;  %s72_s14 = sor.u32 %s71_s8, %s70_s12 }
  0x1a   : > { %s1975_s15 = sshll.u32 %s270_s13, 2  ;;  %p73_p6 = scmp.eq.s32.totalorder %s72_s14, 0 }
  0x1b   : > { %p1977_p7 = pnand %p1566_p5, %p84_p3  ;;  %s283_s17 = sand.u32 1, %s1862_s28  }
  0x1c   : > { %s1983_s18 = scalar_select %p73_p6, %s1842_s23, %s75_s7  }
  0x1d   : > { %s2308_s2 = sld [smem:[#allocation23_spill]]  ;;  %s287_s8 = scalar_lea.vmem [#allocation6], %s1969_s10 }
  0x1e   : > { %2307 = sst [smem:[#allocation20_spill]] %s1983_s18  ;;  %s297_s12 = sshll.u32 %s287_s8, 4  ;;  %s298_s12 = int_to_ptr.vmem [resolvable:$true] %s297_s12 }
  0x1f   : > { %s1990_s14 = scalar_lea.sflag [#allocation7], %s283_s17  ;;  %s1996_s7 = sadd.s32 4294967295, %s1862_s28  }
  0x20   : > { %s1500_s19 = sadd.s32 4294967294, %s1862_s28   ;;  %p88_p8 = scmp.ne.s32.totalorder %s1838_s22, %s1834_s21 }
  0x21   : > { %p89_p9 = scmp.eq.s32.totalorder %s1996_s7, 0  ;;  %p212_p10 = scmp.eq.s32.totalorder %s1996_s7, 3 }
  0x22   : > { %p218_p11 = scmp.eq.s32.totalorder %s1500_s19, 3  ;;  %p1501_p12 = scmp.ge.s32.totalorder %s1862_s28, 1 }
  0x23   : > { %s293_s11 = scalar_lea.hbm %s2308_s2, %s1975_s15  ;;  %p2006_p13 = por %p89_p9, %p88_p8 }
  0x24   : > { %s295_s13 = sshll.u32 %s293_s11, 4  ;;  %p2013_p0 = por %p212_p10, %p82_p1  ;;  %s296_s13 = int_to_ptr.hbm [resolvable:$true] %s295_s13 }
  0x25   : > { %1557 = dma.hbm_to_vmem [thread:$0]  (!%p1977_p7), %s296_s13, 64, %s298_s12, %s1990_s14  }
  0x26   : > { %p2017_p2 = por %p218_p11, %p88_p8  ;;  %p225_p3 = scmp.lt.s32.totalorder %s1862_s28, 5 }
  0x27   : > { %s2313_s5 = sld [smem:[#allocation24_spill]]  ;;  %s266_s29 = scalar_lea.vmem [#allocation2], %s1969_s10 }
  0x28   : > { %s2311_s11 = scalar_select %p2017_p2, 1, 0 }
  0x29   : > { %p2025_p4 = pnand %p1501_p12, %p225_p3  ;;  %s2315_s1 = sld [smem:[#allocation22_spill]] }
  0x2a   : > { %2312 = sst [smem:[#allocation21_spill]] %s2311_s11  ;;  %s276_s27 = sshll.u32 %s266_s29, 4  ;;  %s277_s27 = int_to_ptr.vmem [resolvable:$true] %s276_s27 }
  0x2b   : > { %p1547_p1 = pneg %p2025_p4  ;;  %s1864_s12 = smov [#allocation9]  }
  0x2c   : > { %s314_s2 = scalar_lea.hbm %s2287_s3, %s1975_s15  ;;  %s308_s9 = scalar_lea.vmem [#allocation8], %s1969_s10 }
  0x2d   : > { %s240_s13 = sshll.u32 %s2313_s5, 4  ;;  %p1548_p5 = pnand %p1547_p1, %p89_p9  ;;  %s241_s13 = int_to_ptr.vmem [resolvable:$true] %s240_s13 }
  0x2e   : > { %s2316_s5 = sand.u32 1, %s1842_s23   ;;  %s316_s21 = sshll.u32 %s314_s2, 4  ;;  %s317_s21 = int_to_ptr.hbm [resolvable:$true] %s316_s21 }
  0x2f   : > { %s272_s30 = scalar_lea.hbm %s2315_s1, %s1975_s15  ;;  %s263_s26 = scalar_lea.sflag [#allocation3], %s2316_s5 }
  0x30   : > { %s274_s8 = sshll.u32 %s272_s30, 4  ;;  %s318_s1 = sshll.u32 %s308_s9, 4  ;;  %s275_s8 = int_to_ptr.hbm [resolvable:$true] %s274_s8  ;;  %s319_s1 = int_to_ptr.vmem [resolvable:$true] %s318_s1 }
  0x31   : > { %1550 = dma.vmem_to_smem (!%p1548_p5), %s241_s13, 16, %s1864_s12, [#allocation5]  }
  0x32   : > { %1554 = dma.hbm_to_vmem [thread:$0]  (!%p1977_p7), %s275_s8, 64, %s277_s27, %s263_s26  }
  0x33   : > { %1560 = dma.hbm_to_vmem [thread:$0]  (!%p1977_p7), %s317_s21, 64, %s319_s1, %s1990_s14  }
  0x34   : > { %327 = sbr.rel (%p2025_p4) target bundleno = 733 (0x2dd), region = 44  ;;  %s2053_s29 = sand.u32 (!%p2025_p4), 1, %s1838_s22  }
  0x35   : > { %s2056_s5 = sshll.u32 (!%p2025_p4), %s2053_s29, 2  ;;  %s330_s26 = scalar_lea.sflag (!%p2025_p4), [#allocation3], %s2053_s29 }
  0x36   : > { %s333_s27 = scalar_lea.vmem (!%p2025_p4), [#allocation2], %s2056_s5 }
  0x39   : > { %1817 = dma.done.wait (%p2006_p13), %s330_s26, 64  }
  0x3a   : > { %1819 = vsyncadd (%p2006_p13), %s330_s26, 4294967232  ;;  %s339_s1 = sand.u32 1, %s1996_s7   ;;  %s343_s30 = scalar_lea.vmem [#allocation6], %s2056_s5 }
  0x3b   : > { %s340_s21 = scalar_lea.sflag [#allocation7], %s339_s1 }
  0x3c   : > { %1821 = dma.done.wait (%p2006_p13), %s340_s21, 128  }
  0x3d   : > { %1823 = vsyncadd (%p2006_p13), %s340_s21, 4294967168  ;;  %s353_s10 = scalar_lea.vmem [#allocation8], %s2056_s5 }
  0x3e   : > { %1825 = dma.done.wait (%p89_p9), [#allocation5], 16  }
  0x3f   : > { %1827 = vsyncadd (%p89_p9), [#allocation5], 4294967280 }
  0x40   : > { %364 = sfence }
  0x41   : > { %p407_p6 = scmp.lt.s32.totalorder %s1850_s25, 1  ;;  %p409_p7 = scmp.lt.s32.totalorder %s1846_s24, 1  ;;  %vm431_vm0 = vcmask 1043456   ;;  %v419_v0 = vld [vmem:[%s2288_s4 + $0x8] sm:$0xff]  ;;  %vm421_vm1 = vcmask 31744   ;;  %v418_v1 = vld [vmem:[%s2288_s4] sm:$0xff] }
  0x42   : > { %v426_v2 = vsel %vm421_vm1, %v419_v0, 0  ;;  %v420_v3 = vld [vmem:[%s2288_s4 + $0x10] sm:$0x3]  ;;  %v423_v4 = vsel %vm421_vm1, %v418_v1, 0  ;;  %v416_v5 = vld [vmem:[%s343_s30] sm:$0xf] }
  0x43   : > { %s408_s11 = scalar_select %p407_p6, %s1850_s25, 1  ;;  %v2087_v6 = vand.u32 4294901760, %v426_v2  ;;  %v429_v7 = vsel %vm421_vm1, %v420_v3, 0  ;;  %v2089_v8 = vand.u32 4294901760, %v423_v4  ;;  %v644_v9 = vsel %vm431_vm0, %v416_v5, 0 }
  0x44   : > { %s410_s13 = scalar_select %p409_p7, %s1846_s24, 1  ;;  %v2095_v10 = vand.u32 4294901760, %v429_v7  ;;  %v661_v11 = vand.u32 4294901760, %v644_v9  ;;  %v417_v35 = vld [vmem:[%s353_s10] sm:$0xf]  ;;  %vm1089_vm2 = vcmask 130048  }
  0x45   : > { %s1519_s19 = sshll.u32 %s408_s11, 1  ;;  %v2098_v12 = vsub.f32 %v426_v2, %v2087_v6  ;;  %v2101_v13 = vsub.f32 %v423_v4, %v2089_v8  ;;  %v855_v36 = vsel %vm431_vm0, %v417_v35, 0  ;;  %s1865_s1 = smov 16   ;;  %vm1096_vm3 = vcmask 261120  }
  0x46   : > { %s412_s8 = sadd.s32 %s1519_s19, %s410_s13  ;;  %v2104_v14 = vsub.f32 %v429_v7, %v2095_v10  ;;  %v704_v17 = vsub.f32 %v644_v9, %v661_v11  ;;  %v872_v37 = vand.u32 4294901760, %v855_v36  ;;  %s1866_s21 = smov 17  }
  0x47   : > { %s1520_s12 = sshll.u32 %s412_s8, 2  ;;  %v2107_v15 = vand.u32 4294901760, %v2098_v12  ;;  %v2110_v16 = vand.u32 4294901760, %v2101_v13  ;;  %s1867_s30 = smov 15  }
  0x48   : > { %s414_s26 = scalar_lea.vmem %s2284_s0, %s1520_s12  ;;  %v2124_v22 = vand.u32 4294901760, %v2104_v14  ;;  %v705_v26 = vand.u32 4294901760, %v704_v17  ;;  %v915_v38 = vsub.f32 %v855_v36, %v872_v37  ;;  %s1868_s10 = smov 1  }
  0x49   : > { %v2115_v18 = vld [vmem:[%s414_s26] sm:$0xf]  ;;  %v463_v19 = vsub.f32 %v2098_v12, %v2107_v15  ;;  %v455_v20 = vsub.f32 %v2101_v13, %v2110_v16  ;;  %s1869_s15 = smov 127   ;;  %s1870_s16 = smov 113  }
  0x4a   : > { %v433_v21 = vsel %vm431_vm0, %v2115_v18, 0  ;;  %v471_v28 = vsub.f32 %v2104_v14, %v2124_v22  ;;  %v706_v30 = vsub.f32 %v704_v17, %v705_v26  ;;  %v916_v39 = vand.u32 4294901760, %v915_v38  ;;  %s1871_s18 = smov 112   ;;  %s1872_s14 = smov 111  }
  0x4b   : > { %v450_v23 = vand.u32 4294901760, %v433_v21  ;;  %v2126_v24 = vand.u32 4294901760, %v463_v19  ;;  %v2128_v25 = vand.u32 4294901760, %v455_v20  ;;  %s1527_s7 = sld [smem:[#allocation9 + $0x1]]  ;;  %s1529_s17 = sshll.u32 %s1850_s25, 1 }
  0x4c   : > { %v472_v32 = vand.u32 4294901760, %v471_v28  ;;  %v707_v34 = vand.u32 4294901760, %v706_v30  ;;  %v917_v40 = vsub.f32 %v915_v38, %v916_v39  ;;  %s1330_s11 = sadd.s32 %s1846_s24, %s1529_s17  ;;  %s406_s2 = scalar_lea.vmem [#allocation10], %s2056_s5 }
  0x4d   : > { %1533 = vmatpush.msra.mxu2 %v450_v23  ;;  %v493_v27 = vsub.f32 %v433_v21, %v450_v23  ;;  %451 = vmatpush.msra.mxu0 %v450_v23  ;;  %s1530_s13 = sshll.u32 %s1330_s11, 2  ;;  %s1334_s9 = sshll.u32 %s406_s2, 4  ;;  %s1335_s9 = int_to_ptr.vmem [resolvable:$true] %s1334_s9 }
  0x4e   : > { %465 = vmatmul.f32.vlgmr.msra.gmra.mxu2 %v2126_v24  ;;  %457 = vmatmul.f32.vlgmr.msra.gmra.mxu0 %v2128_v25  ;;  %v918_v41 = vand.u32 4294901760, %v917_v40  ;;  %s1332_s12 = scalar_lea.hbm %s2290_s6, %s1530_s13  ;;  %s1776_s5 = scalar_lea.hbm %s2290_s6, 16 }
  0x4f   : > { %528 = vmatpush.msrb.mxu2 %v493_v27  ;;  %v494_v29 = vand.u32 4294901760, %v493_v27  ;;  %s1336_s26 = sshll.u32 %s1332_s12, 4  ;;  %s1337_s26 = int_to_ptr.hbm [resolvable:$true] %s1336_s26 }
  0x51   : > { %662 = vmatpush.msra.mxu2 %v661_v11  ;;  %v495_v31 = vsub.f32 %v493_v27, %v494_v29  ;;  %599 = vmatpush.msrb.mxu0 %v494_v29 }
  0x53   : > { %739 = vmatpush.msra.mxu0 %v704_v17  ;;  %v496_v33 = vand.u32 4294901760, %v495_v31 }
  0x55   : > { %1534 = vmatpush.msra.mxu3 %v496_v33  ;;  %497 = vmatpush.msra.mxu1 %v496_v33 }
  0x56   : > { %473 = vmatmul.f32.gmra.mxu2 %v472_v32  ;;  %503 = vmatmul.f32.vlgmr.msra.gmra.mxu3 %v2087_v6 }
  0x57   : > { %561 = vmatpush.msrb.mxu3 %v450_v23  ;;  %499 = vmatmul.f32.vlgmr.msra.gmra.mxu1 %v2089_v8 }
  0x58   : > { %629 = vmatpush.msrb.mxu1 %v450_v23  ;;  %601 = vmatmul.f32.vlgmr.msrb.gmra.mxu0 %v2089_v8 }
  0x59   : > { %708 = vmatpush.msra.mxu3 %v707_v34  ;;  %873 = vmatpush.msrb.mxu0 %v872_v37 }
  0x5a   : > { %772 = vmatpush.msra.mxu1 %v661_v11 }
  0x5e   : > { %507 = vmatmul.f32.gmra.mxu3 %v2095_v10  ;;  %531 = vmatmul.f32.vlgmr.msrb.gmra.mxu2 %v2101_v13 }
  0x5f   : > { %631 = vmatmul.f32.vlgmr.msrb.gmra.mxu1 %v2089_v8  ;;  %810 = vmatpush.msrb.mxu2 %v705_v26 }
  0x60   : > { %605 = vmatmul.f32.gmra.mxu0 %v2087_v6  ;;  %919 = vmatpush.msrb.mxu1 %v918_v41 }
  0x66   : > { %536 = vmatmul.f32.gmra.mxu2 %v2098_v12  ;;  %565 = vmatmul.f32.vlgmr.msrb.gmra.mxu3 %v2110_v16 }
  0x67   : > { %635 = vmatmul.f32.gmra.mxu1 %v2087_v6  ;;  %840 = vmatpush.msrb.mxu3 %v661_v11 }
  0x68   : > { %609 = vmatmul.f32.gmra.mxu0 %v2095_v10 }
  0x6e   : > { %541 = vmatmul.f32.gmra.mxu2 %v2104_v14  ;;  %571 = vmatmul.f32.gmra.mxu3 %v2107_v15 }
  0x6f   : > { %639 = vmatmul.f32.gmra.mxu1 %v2095_v10 }
  0x70   : > { %742 = vmatmul.f32.vlgmr.msra.gmra.mxu0 %v2101_v13 }
  0x71   : > { %1021 = vmatpush.msra.mxu0 %v916_v39 }
  0x76   : > { %577 = vmatmul.f32.gmra.mxu3 %v2124_v22  ;;  %668 = vmatmul.f32.vlgmr.msra.gmra.mxu2 %v2128_v25 }
  0x77   : > { %776 = vmatmul.f32.vlgmr.msra.gmra.mxu1 %v2110_v16  ;;  %950 = vmatpush.msra.mxu2 %v915_v38 }
  0x78   : > { %1051 = vmatpush.msra.mxu1 %v872_v37  ;;  %747 = vmatmul.f32.gmra.mxu0 %v2098_v12 }
  0x7e   : > { %676 = vmatmul.f32.gmra.mxu2 %v2126_v24  ;;  %710 = vmatmul.f32.vlgmr.msra.gmra.mxu3 %v2089_v8 }
  0x7f   : > { %782 = vmatmul.f32.gmra.mxu1 %v2107_v15  ;;  %983 = vmatpush.msra.mxu3 %v872_v37 }
  0x80   : > { %752 = vmatmul.f32.gmra.mxu0 %v2104_v14 }
  0x86   : > { %684 = vmatmul.f32.gmra.mxu2 %v472_v32  ;;  %714 = vmatmul.f32.gmra.mxu3 %v2087_v6 }
  0x87   : > { %788 = vmatmul.f32.gmra.mxu1 %v2124_v22 }
  0x88   : > { %879 = vmatmul.f32.vlgmr.msrb.gmra.mxu0 %v2128_v25 }
  0x8e   : > { %718 = vmatmul.f32.gmra.mxu3 %v2095_v10  ;;  %812 = vmatmul.f32.vlgmr.msrb.gmra.mxu2 %v2089_v8 }
  0x8f   : > { %921 = vmatmul.f32.vlgmr.msrb.gmra.mxu1 %v2089_v8 }
  0x90   : > { %887 = vmatmul.f32.gmra.mxu0 %v2126_v24 }
  0x96   : > { %816 = vmatmul.f32.gmra.mxu2 %v2087_v6  ;;  %842 = vmatmul.f32.vlgmr.msrb.gmra.mxu3 %v2089_v8 }
  0x97   : > { %925 = vmatmul.f32.gmra.mxu1 %v2087_v6 }
  0x98   : > { %895 = vmatmul.f32.gmra.mxu0 %v472_v32 }
  0x9e   : > { %820 = vmatmul.f32.gmra.mxu2 %v2095_v10  ;;  %846 = vmatmul.f32.gmra.mxu3 %v2087_v6 }
  0x9f   : > { %929 = vmatmul.f32.gmra.mxu1 %v2095_v10 }
  0xa0   : > { %1023 = vmatmul.f32.vlgmr.msra.gmra.mxu0 %v2089_v8 }
  0xa6   : > { %850 = vmatmul.f32.gmra.mxu3 %v2095_v10  ;;  %953 = vmatmul.f32.vlgmr.msra.gmra.mxu2 %v2101_v13 }
  0xa7   : > { %1053 = vmatmul.f32.vlgmr.msra.gmra.mxu1 %v2089_v8 }
  0xa8   : > { %1027 = vmatmul.f32.gmra.mxu0 %v2087_v6 }
  0xae   : > { %958 = vmatmul.f32.gmra.mxu2 %v2098_v12  ;;  %987 = vmatmul.f32.vlgmr.msra.gmra.mxu3 %v2110_v16 }
  0xaf   : > { %1057 = vmatmul.f32.gmra.mxu1 %v2087_v6 }
  0xb0   : > { %1031 = vmatmul.f32.gmra.mxu0 %v2095_v10 }
  0xb6   : > { %963 = vmatmul.f32.gmra.mxu2 %v2104_v14  ;;  %993 = vmatmul.f32.gmra.mxu3 %v2107_v15 }
  0xb7   : > { %1061 = vmatmul.f32.gmra.mxu1 %v2095_v10 }
  0xbe   : > { %999 = vmatmul.f32.gmra.mxu3 %v2124_v22 }
  0xcb   : > { %v458_v42 = vpop.f32.mrf.mxu0 }
  0xd1   : > { %v466_v43 = vpop.f32.mrf.mxu2 }
  0xd4   : > { %v500_v44 = vpop.f32.mrf.mxu1 }
  0xd5   : > { %v602_v45 = vpop.f32.mrf.mxu0  ;;  %v501_v52 = vadd.f32 %v500_v44, %v458_v42 }
  0xd9   : > { %v474_v46 = vpop.f32.mrf.mxu2  ;;  %v504_v47 = vpop.f32.mrf.mxu3 }
  0xda   : > { %v505_v61 = vadd.f32 %v504_v47, %v466_v43 }
  0xdc   : > { %v632_v48 = vpop.f32.mrf.mxu1 }
  0xdd   : > { %v606_v49 = vpop.f32.mrf.mxu0 }
  0xe1   : > { %v508_v50 = vpop.f32.mrf.mxu3  ;;  %v532_v51 = vpop.f32.mrf.mxu2 }
  0xe2   : > { %v533_v55 = vadd.f32 %v532_v51, %v501_v52  ;;  %v509_v6 = vadd.f32 %v508_v50, %v474_v46 }
  0xe4   : > { %v636_v53 = vpop.f32.mrf.mxu1 }
  0xe5   : > { %v610_v54 = vpop.f32.mrf.mxu0 }
  0xe9   : > { %v537_v56 = vpop.f32.mrf.mxu2  ;;  %v566_v57 = vpop.f32.mrf.mxu3 }
  0xea   : > { %v567_v58 = vadd.f32 %v566_v57, %v533_v55  ;;  %v538_v63 = vadd.f32 %v537_v56, %v505_v61 }
  0xec   : > { %v603_v59 = vadd.f32 %v602_v45, %v567_v58  ;;  %v640_v60 = vpop.f32.mrf.mxu1 }
  0xed   : > { %v743_v0 = vpop.f32.mrf.mxu0 }
  0xee   : > { %v633_v62 = vadd.f32 %v632_v48, %v603_v59 }
  0xf0   : > { %1068 = vrot.lane.b32.xlu0 %v633_v62, %s1865_s1 }
  0xf1   : > { %v542_v1 = vpop.f32.mrf.mxu2  ;;  %v572_v2 = vpop.f32.mrf.mxu3 }
  0xf2   : > { %v573_v3 = vadd.f32 %v572_v2, %v538_v63  ;;  %v543_v8 = vadd.f32 %v542_v1, %v509_v6 }
  0xf4   : > { %v607_v4 = vadd.f32 %v606_v49, %v573_v3  ;;  %v777_v5 = vpop.f32.mrf.mxu1 }
  0xf5   : > { %v748_v12 = vpop.f32.mrf.mxu0 }
  0xf6   : > { %v637_v7 = vadd.f32 %v636_v53, %v607_v4 }
  0xf8   : > { %1070 = vrot.lane.b32.xlu1 %v637_v7, %s1865_s1 }
  0xf9   : > { %v578_v9 = vpop.f32.mrf.mxu3  ;;  %v669_v10 = vpop.f32.mrf.mxu2 }
  0xfa   : > { %v579_v11 = vadd.f32 %v578_v9, %v543_v8 }
  0xfc   : > { %v611_v13 = vadd.f32 %v610_v54, %v579_v11  ;;  %v783_v15 = vpop.f32.mrf.mxu1 }
  0xfd   : > { %v753_v21 = vpop.f32.mrf.mxu0 }
  0xfe   : > { %v641_v14 = vadd.f32 %v640_v60, %v611_v13 }
 0x100   : > { %1072 = vrot.lane.b32.xlu2 %v641_v14, %s1865_s1 }
 0x101   : > { %v677_v16 = vpop.f32.mrf.mxu2  ;;  %v711_v17 = vpop.f32.mrf.mxu3 }
 0x102   : > { %v712_v19 = vadd.f32 %v711_v17, %v669_v10 }
 0x104   : > { %v744_v20 = vadd.f32 %v743_v0, %v712_v19  ;;  %v789_v23 = vpop.f32.mrf.mxu1 }
 0x105   : > { %v880_v29 = vpop.f32.mrf.mxu0 }
 0x106   : > { %v778_v22 = vadd.f32 %v777_v5, %v744_v20 }
 0x109   : > { %v685_v24 = vpop.f32.mrf.mxu2  ;;  %v715_v25 = vpop.f32.mrf.mxu3 }
 0x10a   : > { %v716_v26 = vadd.f32 %v715_v25, %v677_v16 }
 0x10c   : > { %v749_v27 = vadd.f32 %v748_v12, %v716_v26  ;;  %v922_v34 = vpop.f32.mrf.mxu1 }
 0x10d   : > { %v888_v37 = vpop.f32.mrf.mxu0  ;;  %v923_v53 = vadd.f32 %v922_v34, %v880_v29 }
 0x10e   : > { %v784_v28 = vadd.f32 %v783_v15, %v749_v27 }
 0x111   : > { %v719_v30 = vpop.f32.mrf.mxu3  ;;  %v813_v31 = vpop.f32.mrf.mxu2 }
 0x112   : > { %v720_v32 = vadd.f32 %v719_v30, %v685_v24  ;;  %v814_v33 = vadd.f32 %v813_v31, %v778_v22 }
 0x114   : > { %v754_v35 = vadd.f32 %v753_v21, %v720_v32  ;;  %v926_v42 = vpop.f32.mrf.mxu1 }
 0x115   : > { %v896_v47 = vpop.f32.mrf.mxu0  ;;  %v927_v60 = vadd.f32 %v926_v42, %v888_v37 }
 0x116   : > { %v790_v36 = vadd.f32 %v789_v23, %v754_v35 }
 0x119   : > { %v817_v38 = vpop.f32.mrf.mxu2  ;;  %v843_v39 = vpop.f32.mrf.mxu3 }
 0x11a   : > { %v818_v40 = vadd.f32 %v817_v38, %v784_v28  ;;  %v844_v41 = vadd.f32 %v843_v39, %v814_v33 }
 0x11c   : > { %v930_v48 = vpop.f32.mrf.mxu1 }
 0x11d   : > { %v1024_v52 = vpop.f32.mrf.mxu0  ;;  %v931_v5 = vadd.f32 %v930_v48, %v896_v47 }
 0x121   : > { %v821_v43 = vpop.f32.mrf.mxu2  ;;  %v847_v44 = vpop.f32.mrf.mxu3 }
 0x122   : > { %v822_v45 = vadd.f32 %v821_v43, %v790_v36  ;;  %v848_v46 = vadd.f32 %v847_v44, %v818_v40  ;;  %v1100_v44 = vlaneseq }
 0x124   : > { %v1054_v54 = vpop.f32.mrf.mxu1 }
 0x125   : > { %v1028_v62 = vpop.f32.mrf.mxu0 }
 0x129   : > { %v851_v49 = vpop.f32.mrf.mxu3  ;;  %v954_v50 = vpop.f32.mrf.mxu2 }
 0x12a   : > { %v2189_v51 = vadd.f32 %v851_v49, %v822_v45  ;;  %v955_v55 = vadd.f32 %v954_v50, %v923_v53  ;;  %v2223_v45 = vand.u32 127, %v1100_v44 }
 0x12c   : > { %v1058_v1 = vpop.f32.mrf.mxu1  ;;  %v1103_v47 = vcvt.s32.f32 %v2223_v45  ;;  %vm1131_vm6 = vcmp.lt.s32.totalorder %v2223_v45, 17  ;;  %vm1148_vm7 = vcmp.lt.s32.totalorder %v2223_v45, 16  ;;  %vm1161_vm10 = vcmp.lt.s32.totalorder %v2223_v45, 15 }
 0x12d   : > { %v1032_v9 = vpop.f32.mrf.mxu0  ;;  %vm1176_vm11 = vcmp.lt.s32.totalorder %v2223_v45, 1  ;;  %vm1210_vm12 = vcmp.lt.s32.totalorder %v2223_v45, 113  ;;  %vm1195_vm13 = vcmp.lt.s32.totalorder %v2223_v45, 127  ;;  %vm1225_vm14 = vcmp.lt.s32.totalorder %v2223_v45, 112 }
 0x12e   : > { %v1105_v49 = vadd.f32 0.5, %v1103_v47  ;;  %vm1234_vm15 = vcmp.lt.s32.totalorder %v2223_v45, 111 }
 0x131   : > { %v988_v56 = vpop.f32.mrf.mxu3  ;;  %v959_v58 = vpop.f32.mrf.mxu2 }
 0x132   : > { %v989_v57 = vadd.f32 %v988_v56, %v955_v55  ;;  %v960_v63 = vadd.f32 %v959_v58, %v927_v60 }
 0x134   : > { %v1025_v59 = vadd.f32 %v1024_v52, %v989_v57  ;;  %v1062_v11 = vpop.f32.mrf.mxu1  ;;  %v1107_v52 = vmul.f32 0.0625, %v1105_v49 }
 0x136   : > { %v1055_v61 = vadd.f32 %v1054_v54, %v1025_v59  ;;  %v1109_v55 = vfloor.f32 %v1107_v52 }
 0x138   : > { %1080 = vrot.lane.b32.xlu0 %v1055_v61, %s1865_s1  ;;  %v1111_v58 = vmul.f32 16.0, %v1109_v55 }
 0x139   : > { %v994_v0 = vpop.f32.mrf.mxu3  ;;  %v964_v4 = vpop.f32.mrf.mxu2 }
 0x13a   : > { %v995_v2 = vadd.f32 %v994_v0, %v960_v63  ;;  %v965_v7 = vadd.f32 %v964_v4, %v931_v5  ;;  %v1113_v61 = vsub.f32 %v1103_v47, %v1111_v58 }
 0x13c   : > { %v1029_v3 = vadd.f32 %v1028_v62, %v995_v2  ;;  %vm1115_vm4 = vcmp.ge.f32.partialorder %v1113_v61, 0.5  ;;  %vm1121_vm8 = vcmp.le.f32.partialorder %v1113_v61, 14.5 }
 0x13e   : > { %v1059_v6 = vadd.f32 %v1058_v1, %v1029_v3  ;;  %v1873_v1 = vmov 0.0  }
 0x13f   : > { %v1521_v2 = vsel %vm1115_vm4, 1.0, %v1873_v1 }
 0x140   : > { %1082 = vrot.lane.b32.xlu1 %v1059_v6, %s1865_s1 }
 0x141   : > { %v1000_v8 = vpop.f32.mrf.mxu3 }
 0x142   : > { %v1001_v10 = vadd.f32 %v1000_v8, %v965_v7 }
 0x144   : > { %v1033_v12 = vadd.f32 %v1032_v9, %v1001_v10 }
 0x146   : > { %v1063_v13 = vadd.f32 %v1062_v11, %v1033_v12  ;;  %v1523_v11 = vsel %vm1121_vm8, 1.0, %v1873_v1  ;;  %vm1315_vm8 = vcmask 916480  }
 0x148   : > { %1084 = vrot.lane.b32.xlu2 %v1063_v13, %s1865_s1 }
 0x15a   : > { %v1073_v34 = vpop.permute.xlu2 %1072 }
 0x15b   : > { %v1092_v37 = vsel %vm1089_vm2, %v2189_v51, %v1073_v34 }
 0x162   : > { %v1069_v14 = vpop.permute.xlu0 %1068 }
 0x163   : > { %v1090_v15 = vsel %vm1089_vm2, %v844_v41, %v1069_v14  ;;  %v1289_v41 = vld [vmem:[%s333_s27] sm:$0xf]  ;;  %s1241_s27 = sld [smem:[#allocation9]] }
 0x164   : > { %1127 = vrot.lane.b32.xlu0 %v1090_v15, %s1866_s21  ;;  %v1153_v16 = vrot.slane %v1090_v15, 4  ;;  %v1140_v17 = vrot.slane %v1090_v15, 2  ;;  %v1168_v20 = vrot.slane %v1090_v15, 6  ;;  %v1290_v43 = vsub.f32 %v2115_v18, %v1289_v41 }
 0x166   : > { %1157 = vrot.lane.b32.xlu1 %v1153_v16, %s1867_s30  ;;  %1144 = vrot.lane.b32.xlu2 %v1140_v17, %s1865_s1 }
 0x169   : > { %v1242_v58 = vstv %s1241_s27 }
 0x16a   : > { %v1071_v19 = vpop.permute.xlu1 %1070 }
 0x16b   : > { %v2197_v21 = vsel %vm1089_vm2, %v848_v46, %v1071_v19  ;;  %v1102_v46 = vadd.s32 128, %v2223_v45 }
 0x16c   : > { %1172 = vrot.lane.b32.xlu0 %v1168_v20, %s1868_s10  ;;  %v1187_v22 = vrot.slane %v2197_v21, 2  ;;  %v1217_v33 = vrot.slane %v2197_v21, 6  ;;  %v1202_v35 = vrot.slane %v2197_v21, 4 }
 0x16d   : > { %v1104_v48 = vcvt.s32.f32 %v1102_v46 }
 0x16e   : > { %1191 = vrot.lane.b32.xlu2 %v1187_v22, %s1869_s15 }
 0x16f   : > { %v1106_v50 = vadd.f32 0.5, %v1104_v48 }
 0x171   : > { %v1108_v53 = vmul.f32 0.0625, %v1106_v50 }
 0x173   : > { %v1110_v56 = vfloor.f32 %v1108_v53 }
 0x175   : > { %v1112_v59 = vmul.f32 16.0, %v1110_v56 }
 0x177   : > { %v1114_v62 = vsub.f32 %v1104_v48, %v1112_v59 }
 0x179   : > { %vm1116_vm5 = vcmp.ge.f32.partialorder %v1114_v62, 0.5  ;;  %vm1122_vm9 = vcmp.le.f32.partialorder %v1114_v62, 14.5 }
 0x17a   : > { %v1522_v3 = vsel %vm1116_vm5, 1.0, %v1873_v1  ;;  %v1524_v12 = vsel %vm1122_vm9, 1.0, %v1873_v1 }
 0x1a2   : > { %v1085_v38 = vpop.permute.xlu2 %1084 }
 0x1a3   : > { %v1095_v39 = vsel %vm1089_vm2, %v1073_v34, %v1085_v38 }
 0x1a4   : > { %v1099_v42 = vsel %vm1096_vm3, %v1095_v39, 0.0 }
 0x1aa   : > { %v1081_v23 = vpop.permute.xlu0 %1080 }
 0x1ab   : > { %v1093_v24 = vsel %vm1089_vm2, %v1069_v14, %v1081_v23 }
 0x1ac   : > { %v1097_v25 = vsel %vm1096_vm3, %v1093_v24, 0.0 }
 0x1ad   : > { %1129 = vrot.lane.b32.xlu1 %v1097_v25, %s1866_s21  ;;  %v1154_v26 = vrot.slane %v1097_v25, 4  ;;  %v1141_v27 = vrot.slane %v1097_v25, 2  ;;  %v1169_v30 = vrot.slane %v1097_v25, 6  ;;  %s1770_s21 = sshra.s32 %s1337_s26, 4  ;;  %s1771_s21 = int_to_ptr.hbm [resolvable:$true] %s1770_s21 }
 0x1ae   : > { %s1772_s24 = scalar_lea.hbm %s1771_s21, 4  ;;  %p1777_p11 = scmp.lt.s32.totalorder %s1771_s21, %s2290_s6 }
 0x1af   : > { %1159 = vrot.lane.b32.xlu2 %v1154_v26, %s1867_s30  ;;  %1146 = vrot.lane.b32.xlu0 %v1141_v27, %s1865_s1  ;;  %p1773_p8 = scmp.ne.s32.totalorder %s1771_s21, %s1772_s24  ;;  %p1778_p12 = scmp.lt.s32.totalorder %s1776_s5, %s1772_s24 }
 0x1b1   : > { %p1774_p9 = pnand %p1773_p8, %p2013_p0  ;;  %p1779_p13 = por %p1778_p12, %p1777_p11 }
 0x1b2   : > { %v1083_v28 = vpop.permute.xlu1 %1082 }
 0x1b3   : > { %v1094_v29 = vsel %vm1089_vm2, %v1071_v19, %v1083_v28  ;;  %p1775_p10 = pneg %p1774_p9 }
 0x1b4   : > { %v2205_v31 = vsel %vm1096_vm3, %v1094_v29, 0.0 }
 0x1b5   : > { %1174 = vrot.lane.b32.xlu1 %v1169_v30, %s1868_s10  ;;  %v1203_v32 = vrot.slane %v2205_v31, 4  ;;  %v1188_v36 = vrot.slane %v2205_v31, 2  ;;  %v1218_v40 = vrot.slane %v2205_v31, 6  ;;  %p1780_p3 = pnand %p1779_p13, %p1775_p10 }
 0x1b7   : > { %1208 = vrot.lane.b32.xlu2 %v1203_v32, %s1870_s16  ;;  %1221 = vrot.lane.b32.xlu0 %v1217_v33, %s1871_s18 }
 0x1bd   : > { %1206 = vrot.lane.b32.xlu1 %v1202_v35, %s1870_s16 }
 0x1bf   : > { %1230 = vrot.lane.b32.xlu2 %v1092_v37, %s1872_s14  ;;  %1193 = vrot.lane.b32.xlu0 %v1188_v36, %s1869_s15 }
 0x1c0   : > { %v1145_v54 = vpop.permute.xlu2 %1144 }
 0x1c5   : > { %1223 = vrot.lane.b32.xlu1 %v1218_v40, %s1871_s18 }
 0x1c7   : > { %1232 = vrot.lane.b32.xlu0 %v1099_v42, %s1872_s14  ;;  %1302 = vrot.lane.b32.xlu2 %v1289_v41, %s1865_s1 }
 0x1c8   : > { %v1192_v60 = vpop.permute.xlu2 %1191 }
 0x1cd   : > { %1294 = vrot.lane.b32.xlu1 %v1290_v43, %s1865_s1  ;;  %s1320_s1 = scalar_lea.sflag [#allocation4], %s2053_s29 }
 0x1d6   : > { %v1128_v51 = vpop.permute.xlu0 %1127 }
 0x1d8   : > { %v1158_v57 = vpop.permute.xlu1 %1157 }
 0x1de   : > { %v1173_v18 = vpop.permute.xlu0 %1172 }
 0x209   : > { %v1160_v6 = vpop.permute.xlu2 %1159 }
 0x20a   : > { %v1162_v14 = vsel %vm1161_vm10, %v1158_v57, %v1160_v6  ;;  %v1163_v15 = vsel %vm1161_vm10, %v1160_v6, %v1158_v57 }
 0x20b   : > { %v1164_v23 = vmul.f32 %v1523_v11, %v1163_v15  ;;  %v1165_v24 = vmul.f32 %v1524_v12, %v1162_v14 }
 0x211   : > { %v1209_v29 = vpop.permute.xlu2 %1208 }
 0x219   : > { %v1231_v53 = vpop.permute.xlu2 %1230 }
 0x21f   : > { %v1130_v63 = vpop.permute.xlu1 %1129 }
 0x220   : > { %v1132_v4 = vsel %vm1131_vm6, %v1128_v51, %v1130_v63  ;;  %v1133_v5 = vsel %vm1131_vm6, %v1130_v63, %v1128_v51 }
 0x221   : > { %v1147_v0 = vpop.permute.xlu0 %1146  ;;  %v1134_v7 = vmul.f32 %v1521_v2, %v1133_v5  ;;  %v1135_v8 = vmul.f32 %v1522_v3, %v1132_v4 }
 0x222   : > { %v1149_v9 = vsel %vm1148_vm7, %v1145_v54, %v1147_v0  ;;  %v1150_v10 = vsel %vm1148_vm7, %v1147_v0, %v1145_v54 }
 0x223   : > { %v1151_v19 = vadd.f32 %v1150_v10, %v1134_v7  ;;  %v1152_v20 = vadd.f32 %v1149_v9, %v1135_v8  ;;  %v1286_v9 = vstv %s1527_s7 }
 0x225   : > { %v1166_v27 = vadd.f32 %v1164_v23, %v1151_v19  ;;  %v1167_v28 = vadd.f32 %v1165_v24, %v1152_v20 }
 0x227   : > { %v1175_v13 = vpop.permute.xlu1 %1174 }
 0x228   : > { %v1177_v16 = vsel %vm1176_vm11, %v1173_v18, %v1175_v13  ;;  %v1178_v17 = vsel %vm1176_vm11, %v1175_v13, %v1173_v18 }
 0x229   : > { %v1222_v22 = vpop.permute.xlu0 %1221  ;;  %v1179_v25 = vmul.f32 %v1521_v2, %v1178_v17  ;;  %v1180_v26 = vmul.f32 %v1522_v3, %v1177_v16 }
 0x22b   : > { %v1181_v30 = vadd.f32 %v1179_v25, %v1166_v27  ;;  %v1182_v32 = vadd.f32 %v1180_v26, %v1167_v28 }
 0x22d   : > { %v1183_v39 = vadd.f32 %v1181_v30, %v2197_v21  ;;  %v1184_v40 = vadd.f32 %v1182_v32, %v2205_v31  ;;  %v1303_v32 = vpop.permute.xlu2 %1302 }
 0x22f   : > { %v1207_v33 = vpop.permute.xlu1 %1206 }
 0x230   : > { %v1211_v35 = vsel %vm1210_vm12, %v1207_v33, %v1209_v29  ;;  %v1212_v36 = vsel %vm1210_vm12, %v1209_v29, %v1207_v33 }
 0x231   : > { %v1194_v34 = vpop.permute.xlu0 %1193  ;;  %v1213_v43 = vmul.f32 %v1521_v2, %v1211_v35  ;;  %v1214_v44 = vmul.f32 %v1522_v3, %v1212_v36 }
 0x232   : > { %v1196_v37 = vsel %vm1195_vm13, %v1192_v60, %v1194_v34  ;;  %v1197_v38 = vsel %vm1195_vm13, %v1194_v34, %v1192_v60 }
 0x233   : > { %v1198_v41 = vmul.f32 %v1523_v11, %v1196_v37  ;;  %v1199_v42 = vmul.f32 %v1524_v12, %v1197_v38 }
 0x235   : > { %v1200_v46 = vadd.f32 %v1198_v41, %v1183_v39  ;;  %v1201_v47 = vadd.f32 %v1199_v42, %v1184_v40 }
 0x237   : > { %v1224_v48 = vpop.permute.xlu1 %1223  ;;  %v1215_v49 = vadd.f32 %v1213_v43, %v1200_v46  ;;  %v1216_v50 = vadd.f32 %v1214_v44, %v1201_v47 }
 0x238   : > { %v1226_v51 = vsel %vm1225_vm14, %v1222_v22, %v1224_v48  ;;  %v1227_v52 = vsel %vm1225_vm14, %v1224_v48, %v1222_v22 }
 0x239   : > { %v1233_v21 = vpop.permute.xlu0 %1232  ;;  %v1228_v55 = vadd.f32 %v1226_v51, %v1215_v49  ;;  %v1229_v56 = vadd.f32 %v1227_v52, %v1216_v50 }
 0x23a   : > { %v1235_v54 = vsel %vm1234_vm15, %v1231_v53, %v1233_v21  ;;  %v1236_v31 = vsel %vm1234_vm15, %v1233_v21, %v1231_v53 }
 0x23b   : > { %v1237_v57 = vmul.f32 %v1523_v11, %v1235_v54  ;;  %v1238_v18 = vmul.f32 %v1524_v12, %v1236_v31 }
 0x23d   : > { %v1239_v59 = vadd.f32 %v1237_v57, %v1228_v55  ;;  %v1240_v60 = vadd.f32 %v1238_v18, %v1229_v56 }
 0x23f   : > { %v1243_v61 = vadd.f32 %v1242_v58, %v1239_v59  ;;  %v1244_v62 = vadd.f32 %v1242_v58, %v1240_v60  ;;  %v1287_v17 = vadd.f32 %v1286_v9, %v1239_v59  ;;  %v1288_v20 = vadd.f32 %v1286_v9, %v1240_v60  ;;  %v1295_v34 = vpop.permute.xlu1 %1294 }
 0x241   : > { %v1525_v63 = vmul.f32 -1.442695, %v1243_v61  ;;  %v1526_v0 = vmul.f32 -1.442695, %v1244_v62  ;;  %v1299_v28 = vperm.slane %v1287_v17, 1  ;;  %v1300_v33 = vperm.slane %v1288_v20, 1 }
 0x243   : > { %1643 = vpow2.f32 %v1525_v63  ;;  %v1305_v38 = vmul.f32 %v1303_v32, %v1299_v28  ;;  %v1306_v40 = vmul.f32 %v1303_v32, %v1300_v33 }
 0x244   : > { %1645 = vpow2.f32 %v1526_v0 }
 0x249   : > { %v1644_v45 = vpop.eup %1643 }
 0x24a   : > { %v1646_v1 = vpop.eup %1645  ;;  %v1251_v2 = vadd.f32 1.0, %v1644_v45 }
 0x24b   : > { %v1252_v3 = vadd.f32 1.0, %v1646_v1 }
 0x24c   : > { %1647 = vrcp.f32 %v1251_v2  ;;  %v1264_v10 = vand.u32 2147483648, %v1251_v2  ;;  %v1262_v13 = vand.u32 2147483647, %v1251_v2  ;;  %vm1258_vm2 = vweird.f32 %v1251_v2 }
 0x24d   : > { %1649 = vrcp.f32 %v1252_v3  ;;  %v1279_v14 = vand.u32 2147483648, %v1252_v3  ;;  %v1277_v16 = vand.u32 2147483647, %v1252_v3  ;;  %vm1273_vm4 = vweird.f32 %v1252_v3 }
 0x24e   : > { %v1265_v22 = vor.u32 1.1754944e-38, %v1264_v10  ;;  %vm1263_vm5 = vcmp.eq.f32.partialorder %v1262_v13, 8.507059e+37 }
 0x24f   : > { %v1280_v25 = vor.u32 1.1754944e-38, %v1279_v14  ;;  %vm1278_vm7 = vcmp.eq.f32.partialorder %v1277_v16, 8.507059e+37 }
 0x252   : > { %v1648_v4 = vpop.eup %1647 }
 0x253   : > { %v1650_v5 = vpop.eup %1649  ;;  %v1254_v6 = vmul.f32 %v1648_v4, %v1251_v2  ;;  %vm1259_vm0 = vweird.f32 %v1648_v4 }
 0x254   : > { %v1269_v7 = vmul.f32 %v1650_v5, %v1252_v3  ;;  %vm1274_vm1 = vweird.f32 %v1650_v5  ;;  %vm1260_vm3 = vmor %vm1258_vm2, %vm1259_vm0 }
 0x255   : > { %v1255_v8 = vsub.f32 1.0, %v1254_v6  ;;  %vm1275_vm6 = vmor %vm1273_vm4, %vm1274_vm1 }
 0x256   : > { %v1270_v11 = vsub.f32 1.0, %v1269_v7 }
 0x257   : > { %v1256_v12 = vmul.f32 %v1648_v4, %v1255_v8 }
 0x258   : > { %v1271_v15 = vmul.f32 %v1650_v5, %v1270_v11 }
 0x259   : > { %v1257_v19 = vadd.f32 %v1648_v4, %v1256_v12 }
 0x25a   : > { %v1272_v23 = vadd.f32 %v1650_v5, %v1271_v15 }
 0x25b   : > { %v1261_v24 = vsel %vm1260_vm3, %v1648_v4, %v1257_v19 }
 0x25c   : > { %v1266_v26 = vsel %vm1263_vm5, %v1265_v22, %v1261_v24  ;;  %v1276_v27 = vsel %vm1275_vm6, %v1650_v5, %v1272_v23 }
 0x25d   : > { %v1281_v29 = vsel %vm1278_vm7, %v1280_v25, %v1276_v27  ;;  %v1283_v30 = vmul.f32 2.0, %v1266_v26 }
 0x25e   : > { %v1284_v35 = vmul.f32 2.0, %v1281_v29 }
 0x25f   : > { %v1291_v36 = vperm.slane %v1283_v30, 0 }
 0x260   : > { %v1292_v37 = vperm.slane %v1284_v35, 0 }
 0x261   : > { %v1297_v39 = vmul.f32 %v1295_v34, %v1291_v36 }
 0x262   : > { %v1298_v41 = vmul.f32 %v1295_v34, %v1292_v37 }
 0x263   : > { %v1307_v42 = vadd.f32 %v1305_v38, %v1297_v39 }
 0x264   : > { %v1308_v43 = vadd.f32 %v1306_v40, %v1298_v41 }
 0x265   : > { %1311 = vrot.lane.b32.xlu0 %v1307_v42, %s1871_s18 }
 0x266   : > { %1313 = vrot.lane.b32.xlu1 %v1308_v43, %s1871_s18 }
 0x2d7   : > { %v1312_v44 = vpop.permute.xlu0 %1311 }
 0x2d8   : > { %v1314_v46 = vpop.permute.xlu1 %1313 }
 0x2d9   : > { %v1316_v47 = vsel %vm1315_vm8, %v1312_v44, %v1314_v46 }
 0x2da   : > { %1318 = vst [vmem:[%s406_s2] sm:$0xf] %v1316_v47 }
 0x2db   : > { %1783 = shalt.err (!%p1780_p3)
}
 0x2dc   : > { %1545 = dma.vmem_to_hbm [thread:$0]  (%p2013_p0), %s1335_s9, 64, %s1337_s26, %s1320_s1  }
 0x2dd PF: > { %s2317_s29 = sld [smem:[#allocation15_spill]]  ;;  %p1568_p4 = scmp.ge.s32.totalorder %s1862_s28, 2 }
 0x2df   : > { %p1562_p1 = pnand %p1568_p4, %p2017_p2 }
 0x2e1   : > { %p1563_p5 = pneg %p1562_p1 }
 0x2e3   : > { %s1348_s18 = sand.u32 1, %s2317_s29  }
 0x2e4   : > { %s1349_s14 = scalar_lea.sflag [#allocation4], %s1348_s18 }
 0x2e5   : > { %1829 = dma.done.wait (%p1563_p5), %s1349_s14, 64  }
 0x2e6   : > { %1831 = vsyncadd (%p1563_p5), %s1349_s14, 4294967232  ;;  %s26_s28 = sadd.s32 1, %s1862_s28   ;;  %s2319_s27 = sld [smem:[#allocation20_spill]] }
 0x2e7   : > { %p23_p6 = scmp.ge.s32.totalorder %s26_s28, 6   ;;  %s2320_s24 = sld [smem:[#allocation16_spill]] }
 0x2e8   : > { %s2321_s25 = sld [smem:[#allocation17_spill]]  ;;  %s2324_s21 = smov %s1838_s22 }
 0x2e9   : > { %s2322_s26 = sld [smem:[#allocation18_spill]]  ;;  %s2325_s22 = smov %s1842_s23 }
 0x2ea   : > { %s2323_s20 = sld [smem:[#allocation19_spill]] }
 0x2ec   : > { %s2326_s23 = smov %s2319_s27  ;;  %25 = sbr.rel (!%p23_p6) target bundleno = 14 (0xe), region = 121 }
 0x2f0   : > { %s2327_s27 = smov %s2323_s20 }
 0x2f1   :  { %1355 = vsyncpa [#allocation3], 1 }
 0x2f2   :  { %1357 = vsyncpa [#allocation3 + $0x1], 1 }
 0x2f3   :  { %1358 = vsyncpa [#allocation7], 1 }
 0x2f4   :  { %1360 = vsyncpa [#allocation7 + $0x1], 1 }
 0x2f5   :  { %1361 = vsyncpa [#allocation4], 1 }
 0x2f6   :  { %1363 = vsyncpa [#allocation4 + $0x1], 1 }
 0x2f7   :  { %1364 = vsyncpa [#allocation5], 1 }
 0x2f8   :  { %1366 = vsyncpa [#allocation5 + $0x1], 1 }

</bundles_post_ra>
